<compile_context>
chip_gen: v7x
topology: tpu7x:2x2x1
jax: 0.10.0
libtpu: 0.0.40
codegen_flags: <defaults>
</compile_context>

<pallas_src>
import functools
import jax
import jax.numpy as jnp
from jax.experimental import pallas as pl
from jax.experimental.pallas import tpu as pltpu


_VMEM = pl.BlockSpec(memory_space=pltpu.MemorySpace.VMEM)


# ---------------- Fused forward kernel ----------------

def _build_hntm_kernel(n_enc, L, B, V):
    """Single-kernel HNTM forward. Refs = inputs (flat) followed by outputs."""

    def kernel(*refs):
        it = iter(refs)
        # ----- unpack inputs (order fixed by the wrapper) -----
        x_ref = next(it)
        eps_ref = next(it)
        enc = [(next(it), next(it)) for _ in range(n_enc)]          # (Wt[in,out], b[1,out])
        mu_w, mu_b = next(it), next(it)
        lv_w, lv_b = next(it), next(it)
        th_w, th_b = next(it), next(it)
        mw = [(next(it), next(it)) for _ in range(2)]                # module_weight
        bw_t_ref = next(it)                                          # [n_hidden, V]
        bt = [(next(it), next(it)) for _ in range(L)]                # (W[T_i,nh], b[T_i,1])
        dv = [(next(it), next(it), next(it)) for _ in range(L - 1)]  # (W1[T_i,nh], b1[T_i,1], W2t[nh,T_{i+1}])
        # ----- unpack outputs -----
        xr_ref = next(it)
        mu_out = next(it)
        lv_out = next(it)
        dep_out = [next(it) for _ in range(L - 1)]

        f32 = jnp.float32

        # ---- encode ----
        # TODO(synk): nn.Dropout(p=0.01) in train mode is stochastic; implemented
        # as identity (eval-mode semantics) for determinism.
        hid = x_ref[...]
        for (w_ref, b_ref) in enc:
            hid = jnp.maximum(
                jnp.dot(hid, w_ref[...], preferred_element_type=f32) + b_ref[...], 0.0)
        mu = jnp.dot(hid, mu_w[...], preferred_element_type=f32) + mu_b[...]
        logvar = jnp.dot(hid, lv_w[...], preferred_element_type=f32) + lv_b[...]
        weights = hid
        for (w_ref, b_ref) in mw:
            weights = jnp.maximum(
                jnp.dot(weights, w_ref[...], preferred_element_type=f32) + b_ref[...], 0.0)

        # ---- reparameterize (eps ~ U[0,1), matching torch.rand_like) ----
        z = mu + eps_ref[...] * jnp.exp(logvar * 0.5)

        # ---- decode (statically unrolled over L levels, acc stays in VMEM) ----
        hid = jnp.maximum(
            jnp.dot(z, th_w[...], preferred_element_type=f32) + th_b[...], 0.0)
        bw_t = bw_t_ref[...]                                   # [n_hidden, V]
        x_rec = jnp.zeros((B, V), f32)
        for i in range(L):
            bt_w, bt_b = bt[i]
            # beta directly in [T_i, V] layout (== torch beta.transpose(1,0))
            beta = jnp.dot(bt_w[...], bw_t, preferred_element_type=f32) + bt_b[...]
            logits = jnp.dot(hid, beta, preferred_element_type=f32)      # [B, V]
            x_rec = x_rec + logits * weights[:, i:i + 1]                 # static slice
            if i < L - 1:
                d1_w, d1_b, d2_wt = dv[i]
                # pre^T in [T_i, T_{i+1}]; softmax over last (lane) axis ==
                # torch softmax(dim=0) followed by transpose(0,1).
                pre_t = (jnp.dot(d1_w[...], d2_wt[...], preferred_element_type=f32)
                         + d1_b[...])
                m = jnp.max(pre_t, axis=-1, keepdims=True)
                e = jnp.exp(pre_t - m)
                depend = e / jnp.sum(e, axis=-1, keepdims=True)
                dep_out[i][...] = depend
                hid = jnp.dot(hid, depend, preferred_element_type=f32)   # [B, T_{i+1}]
        xr_ref[...] = x_rec
        mu_out[...] = mu
        lv_out[...] = logvar

    return kernel


def hntm_forward(prepped, x, eps, *, encode_dims, topic_dims):
    B, V = x.shape
    L = len(topic_dims)
    n_enc = len(encode_dims) - 2
    latent = encode_dims[-1]

    flat = [x, eps]
    for (w, b) in prepped["encoder"]:
        flat += [w, b]
    flat += list(prepped["fc_mu"]) + list(prepped["fc_logvar"]) + list(prepped["fc_theta3"])
    for (w, b) in prepped["module_weight"]:
        flat += [w, b]
    flat.append(prepped["beta_word_t"])
    for (w, b) in prepped["beta_topics"]:
        flat += [w, b]
    for (d1w, d1b, d2wt) in prepped["depend"]:
        flat += [d1w, d1b, d2wt]

    out_shape = (
        jax.ShapeDtypeStruct((B, V), jnp.float32),
        jax.ShapeDtypeStruct((B, latent), jnp.float32),
        jax.ShapeDtypeStruct((B, latent), jnp.float32),
    ) + tuple(
        jax.ShapeDtypeStruct((topic_dims[i], topic_dims[i + 1]), jnp.float32)
        for i in range(L - 1)
    )

    outs = pl.pallas_call(
        _build_hntm_kernel(n_enc, L, B, V),
        out_shape=out_shape,
        in_specs=[_VMEM] * len(flat),
        out_specs=tuple([_VMEM] * len(out_shape)),
    )(*flat)

    x_reconst, mu, logvar = outs[0], outs[1], outs[2]
    depends = list(outs[3:])
    return x_reconst, mu, logvar, depends


# ---------------- Parameter init (deterministic, torch-Linear-like) ----------------

def init_linear(key, in_f, out_f):
    k1, k2 = jax.random.split(key)
    bound = 1.0 / (in_f ** 0.5)
    w = jax.random.uniform(k1, (out_f, in_f), jnp.float32, -bound, bound)  # torch layout [out, in]
    b = jax.random.uniform(k2, (out_f,), jnp.float32, -bound, bound)
    return (w, b)


def init_hntm_params(key, encode_dims, topic_dims, n_hidden):
    keys = iter(jax.random.split(key, 64))
    p = {}
    p["encoder"] = [init_linear(next(keys), encode_dims[i], encode_dims[i + 1])
                    for i in range(len(encode_dims) - 2)]
    p["fc_mu"] = init_linear(next(keys), encode_dims[-2], encode_dims[-1])
    p["fc_logvar"] = init_linear(next(keys), encode_dims[-2], encode_dims[-1])
    p["fc_theta3"] = init_linear(next(keys), encode_dims[-1], topic_dims[0])
    p["depend_vecs1"] = [init_linear(next(keys), n_hidden, topic_dims[i])
                         for i in range(len(topic_dims) - 1)]
    p["depend_vecs2"] = [init_linear(next(keys), n_hidden, topic_dims[i])
                         for i in range(1, len(topic_dims))]
    p["beta_topics"] = [init_linear(next(keys), n_hidden, topic_dims[i])
                        for i in range(len(topic_dims))]
    p["beta_word"] = init_linear(next(keys), n_hidden, encode_dims[0])
    p["module_weight"] = [init_linear(next(keys), encode_dims[-2], n_hidden),
                          init_linear(next(keys), n_hidden, len(topic_dims))]
    return p


def prepare_params(p, topic_dims):
    """One-time layout prep (outside the hot path): pre-transpose torch [out,in]
    weights to [in,out] for x@W, and reshape biases for in-kernel broadcasting."""
    L = len(topic_dims)
    prepped = {}
    prepped["encoder"] = [(w.T, b.reshape(1, -1)) for (w, b) in p["encoder"]]
    for name in ("fc_mu", "fc_logvar", "fc_theta3"):
        w, b = p[name]
        prepped[name] = (w.T, b.reshape(1, -1))
    prepped["module_weight"] = [(w.T, b.reshape(1, -1)) for (w, b) in p["module_weight"]]
    prepped["beta_word_t"] = p["beta_word"][0].T                       # [n_hidden, V]
    prepped["beta_topics"] = [(w, b.reshape(-1, 1)) for (w, b) in p["beta_topics"]]
    prepped["depend"] = [
        (p["depend_vecs1"][i][0],                 # W1 [T_i, n_hidden]
         p["depend_vecs1"][i][1].reshape(-1, 1),  # b1 [T_i, 1]
         p["depend_vecs2"][i][0].T)               # W2^T [n_hidden, T_{i+1}]
        for i in range(L - 1)
    ]
    return prepped


# ---------------- Example run ----------------

if __name__ == "__main__":
    encode_dims = [64, 32, 16]      # vocab=64, enc hidden=32, latent=16
    topic_dims = [16, 8, 4]         # leaf -> root topic levels
    n_hidden = 32
    B = 4

    key = jax.random.PRNGKey(0)
    kp, kx, ke = jax.random.split(key, 3)
    raw_params = init_hntm_params(kp, encode_dims, topic_dims, n_hidden)
    prepped = jax.tree_util.tree_map(jnp.asarray, prepare_params(raw_params, topic_dims))

    x = jax.random.uniform(kx, (B, encode_dims[0]), jnp.float32)        # bag-of-words-like input
    eps = jax.random.uniform(ke, (B, encode_dims[-1]), jnp.float32)     # torch.rand_like(mu)

    fwd = jax.jit(functools.partial(
        hntm_forward, encode_dims=tuple(encode_dims), topic_dims=tuple(topic_dims)))

    x_reconst, mu, logvar, depends = fwd(prepped, x, eps)
    jax.block_until_ready((x_reconst, mu, logvar, depends))

    assert x_reconst.shape == (B, encode_dims[0])
    assert mu.shape == (B, encode_dims[-1])
    assert logvar.shape == (B, encode_dims[-1])
    assert len(depends) == len(topic_dims) - 1
    assert depends[0].shape == (topic_dims[0], topic_dims[1])
    assert depends[1].shape == (topic_dims[1], topic_dims[2])
    assert bool(jnp.all(jnp.isfinite(x_reconst)))
    print("KERNEL_OK")
</pallas_src>

<mosaic_0001>
module attributes {stable_mosaic.version = 11 : i64} {
  func.func @kernel(%arg0: memref<4x64xf32, #tpu.memory_space<vmem>>, %arg1: memref<4x16xf32, #tpu.memory_space<vmem>>, %arg2: memref<64x32xf32, #tpu.memory_space<vmem>>, %arg3: memref<1x32xf32, #tpu.memory_space<vmem>>, %arg4: memref<32x16xf32, #tpu.memory_space<vmem>>, %arg5: memref<1x16xf32, #tpu.memory_space<vmem>>, %arg6: memref<32x16xf32, #tpu.memory_space<vmem>>, %arg7: memref<1x16xf32, #tpu.memory_space<vmem>>, %arg8: memref<16x16xf32, #tpu.memory_space<vmem>>, %arg9: memref<1x16xf32, #tpu.memory_space<vmem>>, %arg10: memref<32x32xf32, #tpu.memory_space<vmem>>, %arg11: memref<1x32xf32, #tpu.memory_space<vmem>>, %arg12: memref<32x3xf32, #tpu.memory_space<vmem>>, %arg13: memref<1x3xf32, #tpu.memory_space<vmem>>, %arg14: memref<32x64xf32, #tpu.memory_space<vmem>>, %arg15: memref<16x32xf32, #tpu.memory_space<vmem>>, %arg16: memref<16x1xf32, #tpu.memory_space<vmem>>, %arg17: memref<8x32xf32, #tpu.memory_space<vmem>>, %arg18: memref<8x1xf32, #tpu.memory_space<vmem>>, %arg19: memref<4x32xf32, #tpu.memory_space<vmem>>, %arg20: memref<4x1xf32, #tpu.memory_space<vmem>>, %arg21: memref<16x32xf32, #tpu.memory_space<vmem>>, %arg22: memref<16x1xf32, #tpu.memory_space<vmem>>, %arg23: memref<32x8xf32, #tpu.memory_space<vmem>>, %arg24: memref<8x32xf32, #tpu.memory_space<vmem>>, %arg25: memref<8x1xf32, #tpu.memory_space<vmem>>, %arg26: memref<32x4xf32, #tpu.memory_space<vmem>>, %arg27: memref<4x64xf32, #tpu.memory_space<vmem>>, %arg28: memref<4x16xf32, #tpu.memory_space<vmem>>, %arg29: memref<4x16xf32, #tpu.memory_space<vmem>>, %arg30: memref<16x8xf32, #tpu.memory_space<vmem>>, %arg31: memref<8x4xf32, #tpu.memory_space<vmem>>) attributes {dimension_semantics = [], scalar_prefetch = 0 : i64, scratch_operands = 0 : i64, tpu.core_type = #tpu.core_type<tc>} {
    %c0 = arith.constant 0 : index
    %c0_0 = arith.constant 0 : index
    %0 = vector.load %arg0[%c0, %c0_0] : memref<4x64xf32, #tpu.memory_space<vmem>>, vector<4x64xf32>
    %c0_1 = arith.constant 0 : index
    %c0_2 = arith.constant 0 : index
    %1 = vector.load %arg2[%c0_1, %c0_2] : memref<64x32xf32, #tpu.memory_space<vmem>>, vector<64x32xf32>
    %cst = arith.constant dense<0.000000e+00> : vector<4x32xf32>
    %2 = tpu.matmul %0, %1, %cst {dimension_numbers = #tpu.dot_dimension_numbers<[1], [0], [0], [1], [0, 0, 1, 1], [], []>} : vector<4x64xf32>, vector<64x32xf32>, vector<4x32xf32> -> vector<4x32xf32>
    %c0_3 = arith.constant 0 : index
    %c0_4 = arith.constant 0 : index
    %3 = vector.load %arg3[%c0_3, %c0_4] : memref<1x32xf32, #tpu.memory_space<vmem>>, vector<1x32xf32>
    %4 = vector.broadcast %3 : vector<1x32xf32> to vector<4x32xf32>
    %5 = arith.addf %2, %4 : vector<4x32xf32>
    %cst_5 = arith.constant 0.000000e+00 : f32
    %6 = vector.broadcast %cst_5 : f32 to vector<4x32xf32>
    %7 = arith.maximumf %5, %6 : vector<4x32xf32>
    %c0_6 = arith.constant 0 : index
    %c0_7 = arith.constant 0 : index
    %8 = vector.load %arg4[%c0_6, %c0_7] : memref<32x16xf32, #tpu.memory_space<vmem>>, vector<32x16xf32>
    %cst_8 = arith.constant dense<0.000000e+00> : vector<4x16xf32>
    %9 = tpu.matmul %7, %8, %cst_8 {dimension_numbers = #tpu.dot_dimension_numbers<[1], [0], [0], [1], [0, 0, 1, 1], [], []>} : vector<4x32xf32>, vector<32x16xf32>, vector<4x16xf32> -> vector<4x16xf32>
    %c0_9 = arith.constant 0 : index
    %c0_10 = arith.constant 0 : index
    %10 = vector.load %arg5[%c0_9, %c0_10] : memref<1x16xf32, #tpu.memory_space<vmem>>, vector<1x16xf32>
    %11 = vector.broadcast %10 : vector<1x16xf32> to vector<4x16xf32>
    %12 = arith.addf %9, %11 : vector<4x16xf32>
    %c0_11 = arith.constant 0 : index
    %c0_12 = arith.constant 0 : index
    %13 = vector.load %arg6[%c0_11, %c0_12] : memref<32x16xf32, #tpu.memory_space<vmem>>, vector<32x16xf32>
    %cst_13 = arith.constant dense<0.000000e+00> : vector<4x16xf32>
    %14 = tpu.matmul %7, %13, %cst_13 {dimension_numbers = #tpu.dot_dimension_numbers<[1], [0], [0], [1], [0, 0, 1, 1], [], []>} : vector<4x32xf32>, vector<32x16xf32>, vector<4x16xf32> -> vector<4x16xf32>
    %c0_14 = arith.constant 0 : index
    %c0_15 = arith.constant 0 : index
    %15 = vector.load %arg7[%c0_14, %c0_15] : memref<1x16xf32, #tpu.memory_space<vmem>>, vector<1x16xf32>
    %16 = vector.broadcast %15 : vector<1x16xf32> to vector<4x16xf32>
    %17 = arith.addf %14, %16 : vector<4x16xf32>
    %c0_16 = arith.constant 0 : index
    %c0_17 = arith.constant 0 : index
    %18 = vector.load %arg10[%c0_16, %c0_17] : memref<32x32xf32, #tpu.memory_space<vmem>>, vector<32x32xf32>
    %cst_18 = arith.constant dense<0.000000e+00> : vector<4x32xf32>
    %19 = tpu.matmul %7, %18, %cst_18 {dimension_numbers = #tpu.dot_dimension_numbers<[1], [0], [0], [1], [0, 0, 1, 1], [], []>} : vector<4x32xf32>, vector<32x32xf32>, vector<4x32xf32> -> vector<4x32xf32>
    %c0_19 = arith.constant 0 : index
    %c0_20 = arith.constant 0 : index
    %20 = vector.load %arg11[%c0_19, %c0_20] : memref<1x32xf32, #tpu.memory_space<vmem>>, vector<1x32xf32>
    %21 = vector.broadcast %20 : vector<1x32xf32> to vector<4x32xf32>
    %22 = arith.addf %19, %21 : vector<4x32xf32>
    %cst_21 = arith.constant 0.000000e+00 : f32
    %23 = vector.broadcast %cst_21 : f32 to vector<4x32xf32>
    %24 = arith.maximumf %22, %23 : vector<4x32xf32>
    %c0_22 = arith.constant 0 : index
    %c0_23 = arith.constant 0 : index
    %25 = vector.load %arg12[%c0_22, %c0_23] : memref<32x3xf32, #tpu.memory_space<vmem>>, vector<32x3xf32>
    %cst_24 = arith.constant dense<0.000000e+00> : vector<4x3xf32>
    %26 = tpu.matmul %24, %25, %cst_24 {dimension_numbers = #tpu.dot_dimension_numbers<[1], [0], [0], [1], [0, 0, 1, 1], [], []>} : vector<4x32xf32>, vector<32x3xf32>, vector<4x3xf32> -> vector<4x3xf32>
    %c0_25 = arith.constant 0 : index
    %c0_26 = arith.constant 0 : index
    %27 = vector.load %arg13[%c0_25, %c0_26] : memref<1x3xf32, #tpu.memory_space<vmem>>, vector<1x3xf32>
    %28 = vector.broadcast %27 : vector<1x3xf32> to vector<4x3xf32>
    %29 = arith.addf %26, %28 : vector<4x3xf32>
    %cst_27 = arith.constant 0.000000e+00 : f32
    %30 = vector.broadcast %cst_27 : f32 to vector<4x3xf32>
    %31 = arith.maximumf %29, %30 : vector<4x3xf32>
    %c0_28 = arith.constant 0 : index
    %c0_29 = arith.constant 0 : index
    %32 = vector.load %arg1[%c0_28, %c0_29] : memref<4x16xf32, #tpu.memory_space<vmem>>, vector<4x16xf32>
    %cst_30 = arith.constant 5.000000e-01 : f32
    %33 = vector.broadcast %cst_30 : f32 to vector<4x16xf32>
    %34 = arith.mulf %17, %33 : vector<4x16xf32>
    %35 = math.exp %34 : vector<4x16xf32>
    %36 = arith.mulf %32, %35 : vector<4x16xf32>
    %37 = arith.addf %12, %36 : vector<4x16xf32>
    %c0_31 = arith.constant 0 : index
    %c0_32 = arith.constant 0 : index
    %38 = vector.load %arg8[%c0_31, %c0_32] : memref<16x16xf32, #tpu.memory_space<vmem>>, vector<16x16xf32>
    %cst_33 = arith.constant dense<0.000000e+00> : vector<4x16xf32>
    %39 = tpu.matmul %37, %38, %cst_33 {dimension_numbers = #tpu.dot_dimension_numbers<[1], [0], [0], [1], [0, 0, 1, 1], [], []>} : vector<4x16xf32>, vector<16x16xf32>, vector<4x16xf32> -> vector<4x16xf32>
    %c0_34 = arith.constant 0 : index
    %c0_35 = arith.constant 0 : index
    %40 = vector.load %arg9[%c0_34, %c0_35] : memref<1x16xf32, #tpu.memory_space<vmem>>, vector<1x16xf32>
    %41 = vector.broadcast %40 : vector<1x16xf32> to vector<4x16xf32>
    %42 = arith.addf %39, %41 : vector<4x16xf32>
    %cst_36 = arith.constant 0.000000e+00 : f32
    %43 = vector.broadcast %cst_36 : f32 to vector<4x16xf32>
    %44 = arith.maximumf %42, %43 : vector<4x16xf32>
    %c0_37 = arith.constant 0 : index
    %c0_38 = arith.constant 0 : index
    %45 = vector.load %arg14[%c0_37, %c0_38] : memref<32x64xf32, #tpu.memory_space<vmem>>, vector<32x64xf32>
    %cst_39 = arith.constant 0.000000e+00 : f32
    %46 = vector.broadcast %cst_39 : f32 to vector<4x64xf32>
    %c0_40 = arith.constant 0 : index
    %c0_41 = arith.constant 0 : index
    %47 = vector.load %arg15[%c0_40, %c0_41] : memref<16x32xf32, #tpu.memory_space<vmem>>, vector<16x32xf32>
    %cst_42 = arith.constant dense<0.000000e+00> : vector<16x64xf32>
    %48 = tpu.matmul %47, %45, %cst_42 {dimension_numbers = #tpu.dot_dimension_numbers<[1], [0], [0], [1], [0, 0, 1, 1], [], []>} : vector<16x32xf32>, vector<32x64xf32>, vector<16x64xf32> -> vector<16x64xf32>
    %c0_43 = arith.constant 0 : index
    %c0_44 = arith.constant 0 : index
    %49 = vector.load %arg16[%c0_43, %c0_44] : memref<16x1xf32, #tpu.memory_space<vmem>>, vector<16x1xf32>
    %50 = vector.broadcast %49 : vector<16x1xf32> to vector<16x64xf32>
    %51 = arith.addf %48, %50 : vector<16x64xf32>
    %cst_45 = arith.constant dense<0.000000e+00> : vector<4x64xf32>
    %52 = tpu.matmul %44, %51, %cst_45 {dimension_numbers = #tpu.dot_dimension_numbers<[1], [0], [0], [1], [0, 0, 1, 1], [], []>} : vector<4x16xf32>, vector<16x64xf32>, vector<4x64xf32> -> vector<4x64xf32>
    %53 = vector.extract_strided_slice %31 {offsets = [0, 0], sizes = [4, 1], strides = [1, 1]} : vector<4x3xf32> to vector<4x1xf32>
    %54 = vector.broadcast %53 : vector<4x1xf32> to vector<4x64xf32>
    %55 = arith.mulf %52, %54 : vector<4x64xf32>
    %56 = arith.addf %46, %55 : vector<4x64xf32>
    %c0_46 = arith.constant 0 : index
    %c0_47 = arith.constant 0 : index
    %57 = vector.load %arg21[%c0_46, %c0_47] : memref<16x32xf32, #tpu.memory_space<vmem>>, vector<16x32xf32>
    %c0_48 = arith.constant 0 : index
    %c0_49 = arith.constant 0 : index
    %58 = vector.load %arg23[%c0_48, %c0_49] : memref<32x8xf32, #tpu.memory_space<vmem>>, vector<32x8xf32>
    %cst_50 = arith.constant dense<0.000000e+00> : vector<16x8xf32>
    %59 = tpu.matmul %57, %58, %cst_50 {dimension_numbers = #tpu.dot_dimension_numbers<[1], [0], [0], [1], [0, 0, 1, 1], [], []>} : vector<16x32xf32>, vector<32x8xf32>, vector<16x8xf32> -> vector<16x8xf32>
    %c0_51 = arith.constant 0 : index
    %c0_52 = arith.constant 0 : index
    %60 = vector.load %arg22[%c0_51, %c0_52] : memref<16x1xf32, #tpu.memory_space<vmem>>, vector<16x1xf32>
    %61 = vector.broadcast %60 : vector<16x1xf32> to vector<16x8xf32>
    %62 = arith.addf %59, %61 : vector<16x8xf32>
    %cst_53 = arith.constant dense<0xFF800000> : vector<16xf32>
    %63 = vector.multi_reduction <maximumf>, %62, %cst_53 [1] : vector<16x8xf32> to vector<16xf32>
    %64 = vector.shape_cast %63 : vector<16xf32> to vector<16x1xf32>
    %65 = vector.broadcast %64 : vector<16x1xf32> to vector<16x8xf32>
    %66 = arith.subf %62, %65 : vector<16x8xf32>
    %67 = math.exp %66 : vector<16x8xf32>
    %cst_54 = arith.constant dense<0.000000e+00> : vector<16xf32>
    %68 = vector.multi_reduction <add>, %67, %cst_54 [1] : vector<16x8xf32> to vector<16xf32>
    %69 = vector.shape_cast %68 : vector<16xf32> to vector<16x1xf32>
    %70 = vector.broadcast %69 : vector<16x1xf32> to vector<16x8xf32>
    %71 = arith.divf %67, %70 : vector<16x8xf32>
    %c0_55 = arith.constant 0 : index
    %c0_56 = arith.constant 0 : index
    %72 = vector.load %arg30[%c0_55, %c0_56] : memref<16x8xf32, #tpu.memory_space<vmem>>, vector<16x8xf32>
    tpu.vector_store %arg30[%c0_55, %c0_56], %71 {strides = array<i32>} : memref<16x8xf32, #tpu.memory_space<vmem>>, vector<16x8xf32>,
    %cst_57 = arith.constant dense<0.000000e+00> : vector<4x8xf32>
    %73 = tpu.matmul %44, %71, %cst_57 {dimension_numbers = #tpu.dot_dimension_numbers<[1], [0], [0], [1], [0, 0, 1, 1], [], []>} : vector<4x16xf32>, vector<16x8xf32>, vector<4x8xf32> -> vector<4x8xf32>
    %c0_58 = arith.constant 0 : index
    %c0_59 = arith.constant 0 : index
    %74 = vector.load %arg17[%c0_58, %c0_59] : memref<8x32xf32, #tpu.memory_space<vmem>>, vector<8x32xf32>
    %cst_60 = arith.constant dense<0.000000e+00> : vector<8x64xf32>
    %75 = tpu.matmul %74, %45, %cst_60 {dimension_numbers = #tpu.dot_dimension_numbers<[1], [0], [0], [1], [0, 0, 1, 1], [], []>} : vector<8x32xf32>, vector<32x64xf32>, vector<8x64xf32> -> vector<8x64xf32>
    %c0_61 = arith.constant 0 : index
    %c0_62 = arith.constant 0 : index
    %76 = vector.load %arg18[%c0_61, %c0_62] : memref<8x1xf32, #tpu.memory_space<vmem>>, vector<8x1xf32>
    %77 = vector.broadcast %76 : vector<8x1xf32> to vector<8x64xf32>
    %78 = arith.addf %75, %77 : vector<8x64xf32>
    %cst_63 = arith.constant dense<0.000000e+00> : vector<4x64xf32>
    %79 = tpu.matmul %73, %78, %cst_63 {dimension_numbers = #tpu.dot_dimension_numbers<[1], [0], [0], [1], [0, 0, 1, 1], [], []>} : vector<4x8xf32>, vector<8x64xf32>, vector<4x64xf32> -> vector<4x64xf32>
    %80 = vector.extract_strided_slice %31 {offsets = [0, 1], sizes = [4, 1], strides = [1, 1]} : vector<4x3xf32> to vector<4x1xf32>
    %81 = vector.broadcast %80 : vector<4x1xf32> to vector<4x64xf32>
    %82 = arith.mulf %79, %81 : vector<4x64xf32>
    %83 = arith.addf %56, %82 : vector<4x64xf32>
    %c0_64 = arith.constant 0 : index
    %c0_65 = arith.constant 0 : index
    %84 = vector.load %arg24[%c0_64, %c0_65] : memref<8x32xf32, #tpu.memory_space<vmem>>, vector<8x32xf32>
    %c0_66 = arith.constant 0 : index
    %c0_67 = arith.constant 0 : index
    %85 = vector.load %arg26[%c0_66, %c0_67] : memref<32x4xf32, #tpu.memory_space<vmem>>, vector<32x4xf32>
    %cst_68 = arith.constant dense<0.000000e+00> : vector<8x4xf32>
    %86 = tpu.matmul %84, %85, %cst_68 {dimension_numbers = #tpu.dot_dimension_numbers<[1], [0], [0], [1], [0, 0, 1, 1], [], []>} : vector<8x32xf32>, vector<32x4xf32>, vector<8x4xf32> -> vector<8x4xf32>
    %c0_69 = arith.constant 0 : index
    %c0_70 = arith.constant 0 : index
    %87 = vector.load %arg25[%c0_69, %c0_70] : memref<8x1xf32, #tpu.memory_space<vmem>>, vector<8x1xf32>
    %88 = vector.broadcast %87 : vector<8x1xf32> to vector<8x4xf32>
    %89 = arith.addf %86, %88 : vector<8x4xf32>
    %cst_71 = arith.constant dense<0xFF800000> : vector<8xf32>
    %90 = vector.multi_reduction <maximumf>, %89, %cst_71 [1] : vector<8x4xf32> to vector<8xf32>
    %91 = vector.shape_cast %90 : vector<8xf32> to vector<8x1xf32>
    %92 = vector.broadcast %91 : vector<8x1xf32> to vector<8x4xf32>
    %93 = arith.subf %89, %92 : vector<8x4xf32>
    %94 = math.exp %93 : vector<8x4xf32>
    %cst_72 = arith.constant dense<0.000000e+00> : vector<8xf32>
    %95 = vector.multi_reduction <add>, %94, %cst_72 [1] : vector<8x4xf32> to vector<8xf32>
    %96 = vector.shape_cast %95 : vector<8xf32> to vector<8x1xf32>
    %97 = vector.broadcast %96 : vector<8x1xf32> to vector<8x4xf32>
    %98 = arith.divf %94, %97 : vector<8x4xf32>
    %c0_73 = arith.constant 0 : index
    %c0_74 = arith.constant 0 : index
    %99 = vector.load %arg31[%c0_73, %c0_74] : memref<8x4xf32, #tpu.memory_space<vmem>>, vector<8x4xf32>
    tpu.vector_store %arg31[%c0_73, %c0_74], %98 {strides = array<i32>} : memref<8x4xf32, #tpu.memory_space<vmem>>, vector<8x4xf32>,
    %cst_75 = arith.constant dense<0.000000e+00> : vector<4x4xf32>
    %100 = tpu.matmul %73, %98, %cst_75 {dimension_numbers = #tpu.dot_dimension_numbers<[1], [0], [0], [1], [0, 0, 1, 1], [], []>} : vector<4x8xf32>, vector<8x4xf32>, vector<4x4xf32> -> vector<4x4xf32>
    %c0_76 = arith.constant 0 : index
    %c0_77 = arith.constant 0 : index
    %101 = vector.load %arg19[%c0_76, %c0_77] : memref<4x32xf32, #tpu.memory_space<vmem>>, vector<4x32xf32>
    %cst_78 = arith.constant dense<0.000000e+00> : vector<4x64xf32>
    %102 = tpu.matmul %101, %45, %cst_78 {dimension_numbers = #tpu.dot_dimension_numbers<[1], [0], [0], [1], [0, 0, 1, 1], [], []>} : vector<4x32xf32>, vector<32x64xf32>, vector<4x64xf32> -> vector<4x64xf32>
    %c0_79 = arith.constant 0 : index
    %c0_80 = arith.constant 0 : index
    %103 = vector.load %arg20[%c0_79, %c0_80] : memref<4x1xf32, #tpu.memory_space<vmem>>, vector<4x1xf32>
    %104 = vector.broadcast %103 : vector<4x1xf32> to vector<4x64xf32>
    %105 = arith.addf %102, %104 : vector<4x64xf32>
    %cst_81 = arith.constant dense<0.000000e+00> : vector<4x64xf32>
    %106 = tpu.matmul %100, %105, %cst_81 {dimension_numbers = #tpu.dot_dimension_numbers<[1], [0], [0], [1], [0, 0, 1, 1], [], []>} : vector<4x4xf32>, vector<4x64xf32>, vector<4x64xf32> -> vector<4x64xf32>
    %107 = vector.extract_strided_slice %31 {offsets = [0, 2], sizes = [4, 1], strides = [1, 1]} : vector<4x3xf32> to vector<4x1xf32>
    %108 = vector.broadcast %107 : vector<4x1xf32> to vector<4x64xf32>
    %109 = arith.mulf %106, %108 : vector<4x64xf32>
    %110 = arith.addf %83, %109 : vector<4x64xf32>
    %c0_82 = arith.constant 0 : index
    %c0_83 = arith.constant 0 : index
    %111 = vector.load %arg27[%c0_82, %c0_83] : memref<4x64xf32, #tpu.memory_space<vmem>>, vector<4x64xf32>
    tpu.vector_store %arg27[%c0_82, %c0_83], %110 {strides = array<i32>} : memref<4x64xf32, #tpu.memory_space<vmem>>, vector<4x64xf32>,
    %c0_84 = arith.constant 0 : index
    %c0_85 = arith.constant 0 : index
    %112 = vector.load %arg28[%c0_84, %c0_85] : memref<4x16xf32, #tpu.memory_space<vmem>>, vector<4x16xf32>
    tpu.vector_store %arg28[%c0_84, %c0_85], %12 {strides = array<i32>} : memref<4x16xf32, #tpu.memory_space<vmem>>, vector<4x16xf32>,
    %c0_86 = arith.constant 0 : index
    %c0_87 = arith.constant 0 : index
    %113 = vector.load %arg29[%c0_86, %c0_87] : memref<4x16xf32, #tpu.memory_space<vmem>>, vector<4x16xf32>
    tpu.vector_store %arg29[%c0_86, %c0_87], %17 {strides = array<i32>} : memref<4x16xf32, #tpu.memory_space<vmem>>, vector<4x16xf32>,
    return
  }
}

</mosaic_0001>

<bundles_post_ra>
// kernel: hntm_forward.1
= control target key start
LH: loop header
LB: loop body
LE: loop exit
PB: predicated region body
PF: predicated region fallthrough
CT: control target
= control target key end

     0   :  { %s2044_s6 = smov 1   ;;  %s2045_s10 = smov 2   ;;  %s2426_s0 = inlined_call_operand.smem [shape: u32[32], index: -1, kind: input, shape index: {}] }
   0x1   :  { %s2092_s5 = sld [smem:[%s2426_s0]]   ;;  %s2046_s14 = smov 3  }
   0x2   :  { %s2097_s9 = sld [smem:[%s2426_s0 + %s2044_s6]]   ;;  %s2047_s18 = smov 4  }
   0x3   :  { %s2102_s13 = sld [smem:[%s2426_s0 + %s2045_s10]]   ;;  %s2048_s22 = smov 5  }
   0x4   :  { %s2107_s17 = sld [smem:[%s2426_s0 + %s2046_s14]]   ;;  %s2049_s26 = smov 6  }
   0x5   :  { %s2112_s21 = sld [smem:[%s2426_s0 + %s2047_s18]]   ;;  %s2050_s30 = smov 7  }
   0x6   :  { %s2117_s25 = sld [smem:[%s2426_s0 + %s2048_s22]]   ;;  %s2051_s4 = smov 8  }
   0x7   :  { %s2122_s29 = sld [smem:[%s2426_s0 + %s2049_s26]]   ;;  %s2052_s10 = smov 9  }
   0x8   :  { %2432 = sst [smem:[#allocation9_spill]] %s2097_s9  ;;  %s2053_s15 = smov 10  }
   0x9   :  { %s2127_s3 = sld [smem:[%s2426_s0 + %s2050_s30]]   ;;  %s2054_s20 = smov 11  }
   0xa   :  { %s2132_s8 = sld [smem:[%s2426_s0 + %s2051_s4]]   ;;  %s2055_s26 = smov 12  }
   0xb   :  { %s2137_s14 = sld [smem:[%s2426_s0 + %s2052_s10]]   ;;  %s2056_s1 = smov 13  }
   0xc   :  { %s2142_s19 = sld [smem:[%s2426_s0 + %s2053_s15]]   ;;  %s2057_s7 = smov 14  }
   0xd   :  { %s2147_s24 = sld [smem:[%s2426_s0 + %s2054_s20]]   ;;  %s2058_s15 = smov 15  }
   0xe   :  { %s2152_s30 = sld [smem:[%s2426_s0 + %s2055_s26]]   ;;  %s2059_s22 = smov 16  }
   0xf   :  { %s2157_s6 = sld [smem:[%s2426_s0 + %s2056_s1]]   ;;  %s2060_s28 = smov 17  }
  0x10   :  { %s2162_s12 = sld [smem:[%s2426_s0 + %s2057_s7]]   ;;  %s2061_s7 = smov 18  }
  0x11   :  { %2433 = sst [smem:[#allocation10_spill]] %s2137_s14 }
  0x12   :  { %s2167_s20 = sld [smem:[%s2426_s0 + %s2058_s15]]   ;;  %s2062_s15 = smov 19  }
  0x13   :  { %s2172_s27 = sld [smem:[%s2426_s0 + %s2059_s22]]   ;;  %s2063_s22 = smov 20  }
  0x14   :  { %s2177_s4 = sld [smem:[%s2426_s0 + %s2060_s28]]   ;;  %s2064_s28 = smov 21  }
  0x15   :  { %2434 = sst [smem:[#allocation11_spill]] %s2157_s6 }
  0x16   :  { %s2182_s6 = sld [smem:[%s2426_s0 + %s2061_s7]]   ;;  %s2065_s7 = smov 22  }
  0x17   :  { %s2187_s14 = sld [smem:[%s2426_s0 + %s2062_s15]]   ;;  %s2066_s15 = smov 23  }
  0x18   :  { %s2192_s9 = sld [smem:[%s2426_s0 + %s2063_s22]]   ;;  %s2067_s22 = smov 24  }
  0x1a   :  { %2435 = sst [smem:[#allocation12_spill]] %s2177_s4 }
  0x1b   :  { %s2197_s4 = sld [smem:[%s2426_s0 + %s2064_s28]]   ;;  %s2068_s28 = smov 25  }
  0x1c   :  { %2436 = sst [smem:[#allocation13_spill]] %s2182_s6 }
  0x1d   :  { %2437 = sst [smem:[#allocation14_spill]] %s2187_s14 }
  0x1e   :  { %2438 = sst [smem:[#allocation15_spill]] %s2192_s9 }
  0x1f   :  { %s2202_s6 = sld [smem:[%s2426_s0 + %s2065_s7]]   ;;  %s2069_s7 = smov 26  }
  0x20   :  { %s2207_s14 = sld [smem:[%s2426_s0 + %s2066_s15]]   ;;  %s2070_s15 = smov 27  }
  0x21   :  { %2439 = sst [smem:[#allocation16_spill]] %s2197_s4 }
  0x22   :  { %s2212_s9 = sld [smem:[%s2426_s0 + %s2067_s22]]   ;;  %s2071_s22 = smov 28  }
  0x23   :  { %s2217_s4 = sld [smem:[%s2426_s0 + %s2068_s28]]   ;;  %s2072_s28 = smov 29  }
  0x25   :  { %2440 = sst [smem:[#allocation17_spill]] %s2202_s6 }
  0x26   :  { %2441 = sst [smem:[#allocation18_spill]] %s2207_s14 }
  0x27   :  { %s2222_s6 = sld [smem:[%s2426_s0 + %s2069_s7]]   ;;  %s2073_s7 = smov 30  }
  0x28   :  { %2442 = sst [smem:[#allocation19_spill]] %s2212_s9 }
  0x29   :  { %2443 = sst [smem:[#allocation20_spill]] %s2217_s4 }
  0x2a   :  { %s2227_s14 = sld [smem:[%s2426_s0 + %s2070_s15]]   ;;  %s2074_s15 = smov 31  }
  0x2b   :  { %s2232_s9 = sld [smem:[%s2426_s0 + %s2071_s22]]  }
  0x2c   :  { %s2237_s4 = sld [smem:[%s2426_s0 + %s2072_s28]]  }
  0x2d   :  { %2444 = sst [smem:[#allocation21_spill]] %s2222_s6 }
  0x2e   :  { %s2242_s6 = sld [smem:[%s2426_s0 + %s2073_s7]]  }
  0x30   :  { %2445 = sst [smem:[#allocation22_spill]] %s2227_s14 }
  0x31   :  { %s2247_s14 = sld [smem:[%s2426_s0 + %s2074_s15]]  }
  0x32   :  { %69 = vsyncpa [#allocation3], 0  ;;  %v126_v0 = vld [vmem:[%s2102_s13] sm:$0xff]  ;;  %v127_v1 = vld [vmem:[%s2102_s13 + $0x8] sm:$0xff]  ;;  %v2075_v3 = vmov 0.0|0.0   ;;  %vm2076_vm0 = vmmov 0  }
  0x33   :  { %v128_v2 = vld [vmem:[%s2102_s13 + $0x10] sm:$0xff]  ;;  %1836 = vmatprep.subr.bf16.mxu0 %v2075_v3  ;;  %v1837_v4 = vpack.c.bf16 %v127_v1, %v126_v0  ;;  %v129_v5 = vld [vmem:[%s2102_s13 + $0x18] sm:$0xff]  ;;  %v2077_v6 = vmov 0.0   ;;  %1848 = vmatprep.subr.bf16.mxu1 %v2075_v3  ;;  %v216_v8 = vld [vmem:[%s2112_s21] sm:$0xff] }
  0x34   :  { %1698 = vmatprep.mubr.msk.f32.mxu0 %vm2076_vm0, %v2077_v6  ;;  %1709 = vmatprep.mubr.msk.f32.mxu1 %vm2076_vm0, %v2077_v6  ;;  %v1840_v7 = vpack.c.bf16 %v129_v5, %v128_v2  ;;  %v217_v9 = vld [vmem:[%s2112_s21 + $0x8] sm:$0xff]  ;;  %v130_v10 = vld [vmem:[%s2102_s13 + $0x20] sm:$0xff] }
  0x35   :  { %1838 = vmatpush3.bf16.msra.mxu0 %v1837_v4  ;;  %v131_v11 = vld [vmem:[%s2102_s13 + $0x28] sm:$0xff]  ;;  %v1849_v12 = vpack.c.bf16 %v217_v9, %v216_v8 }
  0x36   :  { %1839 = vmatprep.subr.bf16.mxu0 %v2075_v3 }
  0x37   :  { %70 = vsyncpa [#allocation5], 0  ;;  %1850 = vmatpush3.bf16.msra.mxu1 %v1849_v12  ;;  %v1843_v13 = vpack.c.bf16 %v131_v11, %v130_v10  ;;  %v132_v14 = vld [vmem:[%s2102_s13 + $0x30] sm:$0xff]  ;;  %v133_v15 = vld [vmem:[%s2102_s13 + $0x38] sm:$0xff]  ;;  %vm141_vm1 = vcmask 523264   ;;  %vm227_vm2 = vcmask 261120  }
  0x38   :  { %1851 = vmatprep.subr.bf16.mxu1 %v2075_v3  ;;  %v1846_v16 = vpack.c.bf16 %v133_v15, %v132_v14  ;;  %v382_v17 = vld [vmem:[%s2142_s19] sm:$0xff]  ;;  %v383_v18 = vld [vmem:[%s2142_s19 + $0x8] sm:$0xff]  ;;  %v218_v21 = vld [vmem:[%s2112_s21 + $0x10] sm:$0xff]  ;;  %v2078_v51 = vmov 0   ;;  %vm1503_vm3 = vcmask 125952   ;;  %s2446_s0 = sld [smem:[#allocation9_spill]] }
  0x39   :  { %1841 = vmatpush3.bf16.msra.mxu0 %v1840_v7  ;;  %v125_v19 = vld [vmem:[%s2092_s5] sm:$0xf]  ;;  %v1861_v20 = vpack.c.bf16 %v383_v18, %v382_v17  ;;  %v219_v22 = vld [vmem:[%s2112_s21 + $0x18] sm:$0xff]  ;;  %v384_v24 = vld [vmem:[%s2142_s19 + $0x10] sm:$0xff]  ;;  %1955 = vset.pattern.permute.xlu0 %v2078_v51  ;;  %s2447_s5 = sld [smem:[#allocation17_spill]]  ;;  %s2448_s13 = sld [smem:[#allocation18_spill]] }
  0x3a   :  { %1842 = vmatprep.subr.bf16.mxu0 %v2075_v3  ;;  %v1852_v23 = vpack.c.bf16 %v219_v22, %v218_v21  ;;  %v385_v25 = vld [vmem:[%s2142_s19 + $0x18] sm:$0xff]  ;;  %v1586_v27 = vld [vmem:[%s2107_s17] ss:$0 sm:$0xff]  ;;  %v302_v29 = vld [vmem:[%s2122_s29 + $0x8] sm:$0xff]  ;;  %1956 = vset.pattern.permute.xlu1 %v2078_v51  ;;  %vm564_vm4 = vcmask 130048   ;;  %s2449_s17 = sld [smem:[#allocation10_spill]] }
  0x3b   :  { %v1864_v26 = vpack.c.bf16 %v385_v25, %v384_v24  ;;  %v301_v28 = vld [vmem:[%s2122_s29] sm:$0xff]  ;;  %v303_v35 = vld [vmem:[%s2122_s29 + $0x10] sm:$0xff]  ;;  %v304_v36 = vld [vmem:[%s2122_s29 + $0x18] sm:$0xff]  ;;  %s2450_s21 = sld [smem:[#allocation16_spill]]  ;;  %vm917_vm5 = vcmask 64512   ;;  %s2452_s29 = sld [smem:[#allocation20_spill]] }
  0x3c   :  { %1853 = vmatpush3.bf16.msra.mxu1 %v1852_v23  ;;  %v1855_v33 = vpack.c.bf16 %v302_v29, %v301_v28  ;;  %v1858_v37 = vpack.c.bf16 %v304_v36, %v303_v35  ;;  %v464_v38 = vld [vmem:[%s2152_s30] sm:$0xff]  ;;  %v465_v39 = vld [vmem:[%s2152_s30 + $0x8] sm:$0xff]  ;;  %v466_v41 = vld [vmem:[%s2152_s30 + $0x10] sm:$0xff]  ;;  %s2455_s19 = sld [smem:[#allocation19_spill]]  ;;  %vm1255_vm6 = vcmask 31744   ;;  %vm1421_vm7 = vcmask 1043456  }
  0x3d   :  { %1844 = vmatpush3.bf16.msra.mxu0 %v1843_v13  ;;  %1854 = vmatprep.subr.bf16.mxu1 %v2075_v3  ;;  %v1867_v40 = vpack.c.bf16 %v465_v39, %v464_v38  ;;  %v467_v42 = vld [vmem:[%s2152_s30 + $0x18] sm:$0xff]  ;;  %v639_v44 = vld [vmem:[%s2162_s12] sm:$0xff]  ;;  %v640_v45 = vld [vmem:[%s2162_s12 + $0x8] sm:$0xff]  ;;  %s2457_s30 = sld [smem:[#allocation15_spill]] }
  0x3e   :  { %1845 = vmatprep.subr.bf16.mxu0 %v2075_v3  ;;  %v1870_v43 = vpack.c.bf16 %v467_v42, %v466_v41  ;;  %v2305_v46 = vpack.c.bf16 %v640_v45, %v639_v44  ;;  %v555_v47 = vld [vmem:[%s2132_s8] sm:$0xff]  ;;  %v556_v48 = vld [vmem:[%s2132_s8 + $0x8] sm:$0xff]  ;;  %v641_v57 = vld [vmem:[%s2162_s12 + $0x10] sm:$0xff]  ;;  %s2454_s8 = sld [smem:[#allocation21_spill]] }
  0x3f   :  { %v1873_v49 = vpack.c.bf16 %v556_v48, %v555_v47  ;;  %v645_v50 = vld [vmem:[%s2172_s27] sm:$0xff]  ;;  %v646_v52 = vld [vmem:[%s2172_s27 + $0x8] sm:$0xff]  ;;  %v642_v58 = vld [vmem:[%s2162_s12 + $0x18] sm:$0xff] }
  0x40   :  { %649 = vperm.xlu0 %1955, %v645_v50   ;;  %v1588_v53 = vld [vmem:[%s2117_s25] ss:$0 sm:$0xff]  ;;  %v2317_v0 = vpack.c.bf16 %v642_v58, %v641_v57  ;;  %v644_v8 = vld [vmem:[%s2167_s20 + $0x8] sm:$0xff]  ;;  %s2451_s25 = sld [smem:[#allocation13_spill]] }
  0x41   :  { %1847 = vmatpush3.bf16.msra.mxu0 %v1846_v16  ;;  %v1592_v54 = vld [vmem:[%s2147_s24] ss:$0 sm:$0xff]  ;;  %v825_v16 = vld [vmem:[%s2447_s5 + $0x8] sm:$0xff]  ;;  %s2456_s24 = sld [smem:[#allocation11_spill]] }
  0x42   :  { %1860 = vmatprep.subr.bf16.mxu0 %v2075_v3  ;;  %v643_v1 = vld [vmem:[%s2167_s20] sm:$0xff]  ;;  %v821_v23 = vld [vmem:[%s2448_s13 + $0x8] sm:$0xff] }
  0x43   :  { %v1590_v2 = vld [vmem:[%s2127_s3] ss:$0 sm:$0xff]  ;;  %v819_v38 = vld [vmem:[%s2450_s21 + $0x8] sm:$0xff]  ;;  %s2453_s3 = sld [smem:[#allocation12_spill]] }
  0x44   :  { %1699 = vmatmul.mubr.msk.f32.vlgmr.msra.gmra.mrb[0].mxu0 %vm141_vm1, %v125_v19  ;;  %654 = vperm.xlu0 %1955, %v646_v52   ;;  %v549_v11 = vld [vmem:[%s2446_s0] sm:$0xf] }
  0x45   :  { %1862 = vmatpush3.bf16.msra.mxu0 %v1861_v20  ;;  %1731 = vmatprep.mubr.msk.f32.mxu0 %vm2076_vm0, %v2077_v6  ;;  %v824_v15 = vld [vmem:[%s2447_s5] sm:$0xff] }
  0x46   :  { %1863 = vmatprep.subr.bf16.mxu0 %v2075_v3  ;;  %828 = vperm.xlu1 %1956, %v824_v15   ;;  %v820_v22 = vld [vmem:[%s2448_s13] sm:$0xff] }
  0x47   :  { %v1596_v29 = vld [vmem:[%s2449_s17] ss:$0 sm:$0xff] }
  0x48   :  { %v1013_v50 = vld [vmem:[%s2451_s25] sm:$0xff] }
  0x49   :  { %1865 = vmatpush3.bf16.msra.mxu0 %v1864_v26 }
  0x4a   :  { %1872 = vmatprep.subr.bf16.mxu0 %v2075_v3  ;;  %833 = vperm.xlu1 %1956, %v825_v16  }
  0xbf   :  { %v650_v18 = vpop.permute.xlu0 %649 }
  0xc3   :  { %v655_v20 = vpop.permute.xlu0 %654 }
 0x117   :  { %v211_v30 = vpop.f32.mrb[0].mxu0 }
 0x118   :  { %v212_v31 = vadd.f32 %v1586_v27, %v211_v30  ;;  %v1700_v32 = vpop.f32.mrb[1].mxu0  ;;  %v1886_v27 = vpack.c.bf16 %v821_v23, %v820_v22  ;;  %v1171_v22 = vld [vmem:[%s2455_s19] sm:$0xff] }
 0x119   :  { %v823_v32 = vld [vmem:[%s2448_s13 + $0x18] sm:$0xff] }
 0x11a   :  { %v215_v34 = vmax.f32 %v212_v31, 0.0  ;;  %v822_v31 = vld [vmem:[%s2448_s13 + $0x10] sm:$0xff] }
 0x11b   :  { %v1890_v36 = vpack.c.bf16 %v823_v32, %v822_v31  ;;  %v1339_v31 = vld [vmem:[%s2457_s30] sm:$0xf] }
 0x11c   :  { %1710 = vmatmul.mubr.msk.f32.vlgmr.msra.gmra.mrb[0].mxu1 %vm227_vm2, %v215_v34  ;;  %1732 = vmatmul.mubr.msk.f32.vlgmr.msra.gmra.mrb[2].mxu0 %vm227_vm2, %v215_v34 }
 0x11d   :  { %1856 = vmatpush3.bf16.msra.mxu1 %v1855_v33  ;;  %1720 = vmatprep.mubr.msk.f32.mxu1 %vm2076_vm0, %v2077_v6 }
 0x11e   :  { %1857 = vmatprep.subr.bf16.mxu1 %v2075_v3  ;;  %1749 = vmatprep.mubr.msk.f32.mxu0 %vm2076_vm0, %v2077_v6 }
 0x11f   :  { %1874 = vmatpush3.bf16.msra.mxu0 %v1873_v49 }
 0x120   :  { %1883 = vmatprep.subr.bf16.mxu0 %v2075_v3 }
 0x121   :  { %1859 = vmatpush3.bf16.msra.mxu1 %v1858_v37  ;;  %v818_v37 = vld [vmem:[%s2450_s21] sm:$0xff] }
 0x122   :  { %1866 = vmatprep.subr.bf16.mxu1 %v2075_v3 }
 0x124   :  { %1721 = vmatmul.mubr.msk.f32.vlgmr.msra.gmra.mrb[2].mxu1 %vm227_vm2, %v215_v34 }
 0x125   :  { %1868 = vmatpush3.bf16.msra.mxu1 %v1867_v40  ;;  %1742 = vmatprep.mubr.msk.f32.mxu1 %vm2076_vm0, %v2077_v6  ;;  %v829_v40 = vpop.permute.xlu1 %828 }
 0x126   :  { %1869 = vmatprep.subr.bf16.mxu1 %v2075_v3 }
 0x129   :  { %1871 = vmatpush3.bf16.msra.mxu1 %v1870_v43  ;;  %v834_v42 = vpop.permute.xlu1 %833 }
 0x12a   :  { %1876 = vmatprep.subr.bf16.mxu1 %v2305_v46 }
 0x1ef   :  { %v297_v55 = vpop.f32.mrb[0].mxu1  ;;  %v459_v56 = vpop.f32.mrb[2].mxu0 }
 0x1f0   :  { %v298_v59 = vadd.f32 %v1588_v53, %v297_v55  ;;  %v460_v60 = vadd.f32 %v1592_v54, %v459_v56  ;;  %v1711_v61 = vpop.f32.mrb[1].mxu1  ;;  %v1733_v62 = vpop.f32.mrb[3].mxu0 }
 0x1f1   :  { %v1176_v61 = vld [vmem:[%s2452_s29] sm:$0xff] }
 0x1f2   :  { %v463_v63 = vmax.f32 %v460_v60, 0.0  ;;  %1504 = vst.msk [vmem:[#allocation4] sm:$0xf] %vm1503_vm3, %v298_v59 }
 0x1f4   :  { %1743 = vmatmul.mubr.msk.f32.vlgmr.msra.gmra.mrb[4].mxu1 %vm227_vm2, %v463_v63 }
 0x1f5   :  { %1878 = vmatpush3.bf16.msra.mxu1 %v2305_v46  ;;  %1760 = vmatprep.mubr.msk.f32.mxu1 %vm227_vm2, %v643_v1 }
 0x1f6   :  { %1880 = vmatprep.subr.bf16.mxu1 %v2317_v0 }
 0x1f7   :  { %v378_v4 = vpop.f32.mrb[2].mxu1 }
 0x1f8   :  { %v379_v5 = vadd.f32 %v1590_v2, %v378_v4  ;;  %v1722_v7 = vpop.f32.mrb[3].mxu1 }
 0x1f9   :  { %1882 = vmatpush3.bf16.msra.mxu1 %v2317_v0 }
 0x1fa   :  { %v550_v9 = vmul.f32 0.5, %v379_v5  ;;  %1894 = vmatprep.subr.bf16.mxu1 %v2075_v3  ;;  %1505 = vst.msk [vmem:[#allocation6] sm:$0xf] %vm1503_vm3, %v379_v5 }
 0x1fc   :  { %v551_v10 = vmul.f32 1.442695, %v550_v9  ;;  %1761 = vmatmul.mubr.msk.f32.vlgmr.msra.gmra.mrb[6].mxu1 %vm227_vm2, %v644_v8  ;;  %v1012_v8 = vld [vmem:[%s2453_s3] sm:$0xff] }
 0x1fd   :  { %1785 = vmatprep.mubr.msk.f32.mxu1 %vm2076_vm0, %v2077_v6 }
 0x1fe   :  { %1960 = vpow2.f32 %v551_v10 }
 0x208   :  { %v1961_v12 = vpop.eup %1960 }
 0x209   :  { %v553_v13 = vmul.f32 %v1961_v12, %v549_v11  ;;  %v1172_v11 = vld [vmem:[%s2454_s8] sm:$0xff]  ;;  %v1173_v12 = vld [vmem:[%s2454_s8 + $0x8] sm:$0xff] }
 0x20b   :  { %v554_v14 = vadd.f32 %v553_v13, %v298_v59 }
 0x20d   :  { %1750 = vmatmul.mubr.msk.f32.vlgmr.msra.gmra.mrb[4].mxu0 %vm564_vm4, %v554_v14 }
 0x20e   :  { %1767 = vmatprep.mubr.msk.f32.mxu0 %vm2076_vm0, %v2077_v6 }
 0x2c7   :  { %v2339_v17 = vpop.f32.mrb[4].mxu1 }
 0x2c8   :  { %v1744_v19 = vpop.f32.mrb[5].mxu1 }
 0x2c9   :  { %v1174_v19 = vld [vmem:[%s2454_s8 + $0x10] sm:$0xff] }
 0x2cf   :  { %v1762_v21 = vpop.f32.mrb[6].mxu1 }
 0x2d0   :  { %v735_v24 = vadd.f32 %v1762_v21, %v655_v20  ;;  %v729_v25 = vpop.f32.mrb[7].mxu1  ;;  %v1175_v20 = vld [vmem:[%s2454_s8 + $0x18] sm:$0xff] }
 0x2d1   :  { %v730_v26 = vadd.f32 %v729_v25, %v650_v18  ;;  %v1904_v18 = vpack.c.bf16 %v1173_v12, %v1172_v11  ;;  %v1907_v21 = vpack.c.bf16 %v1175_v20, %v1174_v19 }
 0x2d3   :  { %v1884_v28 = vpack.c.bf16 %v735_v24, %v730_v26 }
 0x2d5   :  { %1885 = vmatpush3.bf16.msra.mxu0 %v1884_v28 }
 0x2d6   :  { %1887 = vmatprep.subr.bf16.mxu0 %v1886_v27 }
 0x2e0   :  { %v634_v30 = vpop.f32.mrb[4].mxu0 }
 0x2e1   :  { %v635_v33 = vadd.f32 %v1596_v29, %v634_v30  ;;  %v1751_v34 = vpop.f32.mrb[5].mxu0  ;;  %v1594_v30 = vld [vmem:[%s2456_s24] ss:$0 sm:$0xff] }
 0x2e2   :  { %v545_v32 = vadd.f32 %v1594_v30, %v2339_v17  ;;  %v2079_v34 = vmov 1  }
 0x2e3   :  { %v638_v35 = vmax.f32 %v635_v33, 0.0 }
 0x2e4   :  { %v548_v33 = vmax.f32 %v545_v32, 0.0 }
 0x2e5   :  { %1768 = vmatmul.mubr.msk.f32.vlgmr.msra.gmra.mrb[6].mxu0 %vm564_vm4, %v638_v35 }
 0x2e6   :  { %1889 = vmatpush3.bf16.msra.mxu0 %v1886_v27  ;;  %1778 = vmatprep.mubr.msk.f32.mxu0 %vm227_vm2, %v818_v37 }
 0x2e7   :  { %1891 = vmatprep.subr.bf16.mxu0 %v1890_v36 }
 0x2ea   :  { %1893 = vmatpush3.bf16.msra.mxu0 %v1890_v36 }
 0x2eb   :  { %1799 = vmatprep.subr.mxu0 %v2077_v6 }
 0x2ed   :  { %1779 = vmatmul.mubr.msk.f32.vlgmr.msra.gmra.mrb[8].mxu0 %vm227_vm2, %v819_v38 }
 0x2ee   :  { %1801 = vmatprep.mubr.msk.f32.mxu0 %vm2076_vm0, %v2077_v6 }
 0x3b8   :  { %v2354_v39 = vpop.f32.mrb[6].mxu0 }
 0x3b9   :  { %v1769_v41 = vpop.f32.mrb[7].mxu0 }
 0x3c0   :  { %v1780_v43 = vpop.f32.mrb[8].mxu0 }
 0x3c1   :  { %v914_v44 = vadd.f32 %v1780_v43, %v834_v42  ;;  %v908_v45 = vpop.f32.mrb[9].mxu0 }
 0x3c2   :  { %v909_v47 = vadd.f32 %v908_v45, %v829_v40 }
 0x3c3   :  { %v921_v48 = vsel %vm917_vm5, %v914_v44, -inf }
 0x3c4   :  { %922 = vmax.xlane.f32.xlu1 %v921_v48  ;;  %v918_v49 = vsel %vm917_vm5, %v909_v47, -inf }
 0x3c5   :  { %919 = vmax.xlane.f32.xlu0 %v918_v49 }
 0x3d5   :  { %1016 = vperm.xlu1 %1956, %v1013_v50  }
 0x451   :  { %v923_v51 = vpop.xlane.xlu1 %922 }
 0x452   :  { %v925_v52 = vsub.f32 %v914_v44, %v923_v51  ;;  %v920_v53 = vpop.xlane.xlu0 %919 }
 0x453   :  { %v924_v54 = vsub.f32 %v909_v47, %v920_v53 }
 0x454   :  { %v928_v55 = vmul.f32 1.442695, %v925_v52 }
 0x455   :  { %v926_v56 = vmul.f32 1.442695, %v924_v54  ;;  %v1017_v13 = vpop.permute.xlu1 %1016 }
 0x457   :  { %1962 = vpow2.f32 %v926_v56 }
 0x458   :  { %1964 = vpow2.f32 %v928_v55 }
 0x461   :  { %v1963_v57 = vpop.eup %1962 }
 0x462   :  { %v930_v58 = vsel %vm917_vm5, %v1963_v57, 0.0  ;;  %v1965_v59 = vpop.eup %1964 }
 0x463   :  { %931 = vadd.xlane.f32.xlu0 %v930_v58  ;;  %v933_v60 = vsel %vm917_vm5, %v1965_v59, 0.0 }
 0x467   :  { %934 = vadd.xlane.f32.xlu0 %v933_v60 }
 0x47d   :  { %1179 = vperm.xlu0 %1955, %v1176_v61  }
 0x4f0   :  { %v932_v62 = vpop.xlane.xlu0 %931 }
 0x4f1   :  { %1966 = vrcp.f32 %v932_v62 }
 0x4f4   :  { %v935_v63 = vpop.xlane.xlu0 %934 }
 0x4f5   :  { %1968 = vrcp.f32 %v935_v63 }
 0x4fb   :  { %v1967_v1 = vpop.eup %1966 }
 0x4fc   :  { %v937_v2 = vmul.f32 %v1967_v1, %v1963_v57  ;;  %v1180_v25 = vpop.permute.xlu0 %1179 }
 0x4fe   :  { %940 = vst.msk [vmem:[%s2242_s6] sm:$0xff] %vm917_vm5, %v937_v2 }
 0x4ff   :  { %v1969_v4 = vpop.eup %1968 }
 0x500   :  { %v939_v5 = vmul.f32 %v1969_v4, %v1965_v59 }
 0x502   :  { %941 = vst.msk [vmem:[%s2242_s6 + $0x8] sm:$0xff] %vm917_vm5, %v939_v5  ;;  %v1895_v7 = vpack.c.bf16 %v939_v5, %v937_v2  ;;  %s2458_s6 = sld [smem:[#allocation14_spill]] }
 0x504   :  { %1896 = vmatpush3.bf16.msra.mxu1 %v1895_v7 }
 0x505   :  { %1897 = vmatprep.subr.bf16.mxu1 %v2075_v3 }
 0x507   :  { %1786 = vmatmul.mubr.msk.f32.vlgmr.msra.gmra.mrb[8].mxu1 %vm564_vm4, %v638_v35  ;;  %v2080_v35 = vmov 2  }
 0x508   :  { %1899 = vmatpush3.bf16.msra.mxu1 %v2305_v46  ;;  %1796 = vmatprep.mubr.msk.f32.mxu1 %vm2076_vm0, %v2077_v6 }
 0x509   :  { %1900 = vmatprep.subr.bf16.mxu1 %v2075_v3 }
 0x50c   :  { %1902 = vmatpush3.bf16.msra.mxu1 %v2317_v0 }
 0x50d   :  { %1815 = vmatprep.subr.mxu1 %v2077_v6 }
 0x50f   :  { %1797 = vmatmul.mubr.msk.f32.vlgmr.msra.gmra.mrb[10].mxu1 %vm227_vm2, %v1012_v8 }
 0x510   :  { %1817 = vmatprep.mubr.msk.f32.mxu1 %vm2076_vm0, %v2077_v6 }
 0x5da   :  { %v2378_v9 = vpop.f32.mrb[8].mxu1 }
 0x5db   :  { %v1787_v10 = vpop.f32.mrb[9].mxu1 }
 0x5e2   :  { %v1088_v14 = vpop.f32.mrb[10].mxu1 }
 0x5e3   :  { %v1089_v15 = vadd.f32 %v1088_v14, %v1017_v13  ;;  %v1798_v16 = vpop.f32.mrb[11].mxu1 }
 0x5e5   :  { %1800 = vmatpush3.msra.mxu0 %v1089_v15 }
 0x5e6   :  { %1802 = vmatmul.mubr.msk.f32.vlgmr.msra.gmra.mrb[10].mxu0 %vm917_vm5, %v2378_v9  ;;  %1903 = vmatprep.subr.bf16.mxu0 %v2075_v3 }
 0x5e7   :  { %1905 = vmatpush3.bf16.msra.mxu0 %v1904_v18  ;;  %1812 = vmatprep.mubr.msk.f32.mxu0 %vm2076_vm0, %v2077_v6 }
 0x5e8   :  { %1906 = vmatprep.subr.bf16.mxu0 %v2075_v3 }
 0x5eb   :  { %1908 = vmatpush3.bf16.msra.mxu0 %v1907_v21 }
 0x5ec   :  { %1831 = vmatprep.subr.mxu0 %v2077_v6 }
 0x5ee   :  { %1813 = vmatmul.mubr.msk.f32.vlgmr.msra.gmra.mrb[12].mxu0 %vm227_vm2, %v1171_v22 }
 0x5ef   :  { %1833 = vmatprep.mubr.msk.f32.mxu0 %vm2076_vm0, %v2077_v6 }
 0x6b9   :  { %v1161_v23 = vpop.f32.mrb[10].mxu0 }
 0x6ba   :  { %v1803_v24 = vpop.f32.mrb[11].mxu0 }
 0x6c1   :  { %v1251_v26 = vpop.f32.mrb[12].mxu0 }
 0x6c2   :  { %v1252_v27 = vadd.f32 %v1251_v26, %v1180_v25  ;;  %v1814_v28 = vpop.f32.mrb[13].mxu0 }
 0x6c4   :  { %v1256_v29 = vsel %vm1255_vm6, %v1252_v27, -inf }
 0x6c5   :  { %1257 = vmax.xlane.f32.xlu1 %v1256_v29 }
 0x6d6   :  { %1342 = vperm.xlu1 %1956, %v1339_v31  }
 0x6da   :  { %1957 = vset.pattern.permute.xlu1 %v2079_v34 }
 0x6db   :  { %1166 = vperm.xlu1 %1957, %v548_v33  }
 0x6df   :  { %1958 = vset.pattern.permute.xlu1 %v2080_v35 }
 0x6e0   :  { %1496 = vperm.xlu1 %1958, %v548_v33  }
 0x752   :  { %v1258_v36 = vpop.xlane.xlu1 %1257 }
 0x753   :  { %v1259_v37 = vsub.f32 %v1252_v27, %v1258_v36 }
 0x755   :  { %v1260_v38 = vmul.f32 1.442695, %v1259_v37 }
 0x756   :  { %v1343_v17 = vpop.permute.xlu1 %1342 }
 0x757   :  { %1970 = vpow2.f32 %v1260_v38 }
 0x75a   :  { %v1167_v43 = vpop.permute.xlu1 %1166 }
 0x75b   :  { %v1169_v45 = vmul.f32 %v1167_v43, %v1161_v23 }
 0x761   :  { %v1971_v40 = vpop.eup %1970 }
 0x762   :  { %v1262_v41 = vsel %vm1255_vm6, %v1971_v40, 0.0 }
 0x763   :  { %1263 = vadd.xlane.f32.xlu0 %v1262_v41 }
 0x779   :  { %813 = vperm.xlu0 %1955, %v548_v33  }
 0x77d   :  { %1959 = vset.pattern.permute.xlu0 %v2080_v35 }
 0x7f0   :  { %v1264_v42 = vpop.xlane.xlu0 %1263 }
 0x7f1   :  { %1972 = vrcp.f32 %v1264_v42 }
 0x7f8   :  { %v814_v44 = vpop.permute.xlu0 %813 }
 0x7f9   :  { %v816_v47 = vmul.f32 %v814_v44, %v2354_v39  ;;  %v1338_v39 = vld [vmem:[%s2458_s6] sm:$0xf] }
 0x7fb   :  { %v1973_v48 = vpop.eup %1972  ;;  %v1170_v49 = vadd.f32 %v1169_v45, %v816_v47 }
 0x7fc   :  { %v1266_v50 = vmul.f32 %v1973_v48, %v1971_v40 }
 0x7fe   :  { %1267 = vst.msk [vmem:[%s2247_s14] sm:$0xff] %vm1255_vm6, %v1266_v50  ;;  %1816 = vmatpush3.msra.mxu1 %v1266_v50  ;;  %s2081_s14 = smov [#allocation4]  }
 0x7ff   :  { %1818 = vmatmul.mubr.msk.f32.vlgmr.msra.gmra.mrb[12].mxu1 %vm917_vm5, %v2378_v9  ;;  %1909 = vmatprep.subr.bf16.mxu1 %v2075_v3  ;;  %s1522_s12 = sshll.u32 %s2081_s14, 4  ;;  %s1523_s12 = int_to_ptr.vmem [resolvable:$true] %s1522_s12 }
 0x800   :  { %1911 = vmatpush3.bf16.msra.mxu1 %v2305_v46  ;;  %1828 = vmatprep.mubr.msk.f32.mxu1 %vm2076_vm0, %v2077_v6  ;;  %s1974_s20 = scalar_lea.vmem %s1523_s12, 64  ;;  %p1979_p1 = scmp.lt.s32.totalorder %s1523_s12, %s1523_s12 }
 0x801   :  { %1912 = vmatprep.subr.bf16.mxu1 %v2075_v3  ;;  %p1975_p0 = scmp.ne.s32.totalorder %s1523_s12, %s1974_s20  ;;  %p1980_p2 = scmp.lt.s32.totalorder %s1974_s20, %s1974_s20 }
 0x803   :  { %p1981_p3 = por %p1980_p2, %p1979_p1 }
 0x804   :  { %1914 = vmatpush3.bf16.msra.mxu1 %v2317_v0 }
 0x805   :  { %p1982_p4 = pnand %p1981_p3, %p1975_p0 }
 0x807   :  { %1829 = vmatmul.mubr.msk.f32.vlgmr.msra.gmra.mrb[14].mxu1 %vm227_vm2, %v1338_v39 }
 0x8d2   :  { %v1334_v51 = vpop.f32.mrb[12].mxu1 }
 0x8d3   :  { %v1819_v52 = vpop.f32.mrb[13].mxu1 }
 0x8da   :  { %v1414_v53 = vpop.f32.mrb[14].mxu1 }
 0x8db   :  { %v1415_v54 = vadd.f32 %v1414_v53, %v1343_v17  ;;  %v1830_v55 = vpop.f32.mrb[15].mxu1 }
 0x8dd   :  { %1832 = vmatpush3.msk.msra.mxu0 %vm1421_vm7, %v1415_v54 }
 0x8de   :  { %1834 = vmatmul.mubr.msk.f32.vlgmr.msra.gmra.mrb[14].mxu0 %vm1255_vm6, %v1334_v51 }
 0x8df   :  { %1985 = shalt.err (!%p1982_p4)
}
 0x8e0   :  { %s1986_s27 = scalar_lea.hbm %s2232_s9, 64 }
 0x8e1   :  { %p1987_p5 = scmp.ne.s32.totalorder %s2232_s9, %s1986_s27  ;;  %p1990_p6 = scmp.lt.u32.totalorder %s1986_s27, %s2232_s9 }
 0x8e3   :  { %p1992_p7 = pnand %p1990_p6, %p1987_p5 }
 0x8e5   :  { %1995 = shalt.err (!%p1992_p7)
}
 0x8e6   :  { %1525 = dma.vmem_to_hbm [thread:$0]  %s1523_s12, 64, %s2232_s9, [#allocation5]  }
 0x8e7   :  { %s2082_s22 = smov [#allocation6]  }
 0x8e8   :  { %s1532_s23 = sshll.u32 %s2082_s22, 4  ;;  %s1533_s23 = int_to_ptr.vmem [resolvable:$true] %s1532_s23 }
 0x8e9   :  { %s1996_s26 = scalar_lea.vmem %s1533_s23, 64  ;;  %p2001_p9 = scmp.lt.s32.totalorder %s1533_s23, %s1533_s23 }
 0x8ea   :  { %p1997_p8 = scmp.ne.s32.totalorder %s1533_s23, %s1996_s26  ;;  %p2002_p10 = scmp.lt.s32.totalorder %s1996_s26, %s1996_s26 }
 0x8ec   :  { %p2003_p11 = por %p2002_p10, %p2001_p9 }
 0x8ee   :  { %p2004_p12 = pnand %p2003_p11, %p1997_p8 }
 0x8f0   :  { %2007 = shalt.err (!%p2004_p12)
}
 0x8f1   :  { %s2008_s28 = scalar_lea.hbm %s2237_s4, 64 }
 0x8f2   :  { %p2009_p13 = scmp.ne.s32.totalorder %s2237_s4, %s2008_s28  ;;  %p2012_p0 = scmp.lt.u32.totalorder %s2008_s28, %s2237_s4 }
 0x8f4   :  { %p2014_p1 = pnand %p2012_p0, %p2009_p13 }
 0x8f6   :  { %2017 = shalt.err (!%p2014_p1)
}
 0x8f7   :  { %1535 = dma.vmem_to_hbm [thread:$0]  %s1533_s23, 64, %s2237_s4, [#allocation5]   ;;  %v1497_v3 = vpop.permute.xlu1 %1496  ;;  %vm1501_vm8 = vcmask 519168  }
 0x8f8   :  { %s2083_s9 = smov [#allocation2]  }
 0x8f9   :  { %s1512_s1 = sshll.u32 %s2083_s9, 4  ;;  %s1513_s1 = int_to_ptr.vmem [resolvable:$true] %s1512_s1 }
 0x8fa   :  { %s2018_s2 = scalar_lea.vmem %s1513_s1, 64  ;;  %p2023_p3 = scmp.lt.s32.totalorder %s1513_s1, %s1513_s1 }
 0x8fb   :  { %p2019_p2 = scmp.ne.s32.totalorder %s1513_s1, %s2018_s2  ;;  %p2024_p4 = scmp.lt.s32.totalorder %s2018_s2, %s2018_s2 }
 0x8fd   :  { %p2025_p5 = por %p2024_p4, %p2023_p3 }
 0x8ff   :  { %p2026_p6 = pnand %p2025_p5, %p2019_p2 }
 0x9b1   :  { %v1491_v6 = vpop.f32.mrb[14].mxu0 }
 0x9b2   :  { %v1499_v46 = vmul.f32 %v1497_v3, %v1491_v6  ;;  %v1835_v0 = vpop.f32.mrb[15].mxu0 }
 0x9b4   :  { %v1500_v56 = vadd.f32 %v1499_v46, %v1170_v49 }
 0x9b6   :  { %1502 = vst.msk [vmem:[#allocation2] sm:$0xf] %vm1501_vm8, %v1500_v56 }
 0x9b7   :  { %2029 = shalt.err (!%p2026_p6)
}
 0x9b8   :  { %s2459_s7 = sld [smem:[#allocation22_spill]] }
 0x9be   :  { %s2030_s4 = scalar_lea.hbm %s2459_s7, 64 }
 0x9bf   :  { %p2031_p7 = scmp.ne.s32.totalorder %s2459_s7, %s2030_s4  ;;  %p2034_p8 = scmp.lt.u32.totalorder %s2030_s4, %s2459_s7 }
 0x9c1   :  { %p2036_p9 = pnand %p2034_p8, %p2031_p7 }
 0x9c3   :  { %2039 = shalt.err (!%p2036_p9)
}
 0x9c4   :  { %1515 = dma.vmem_to_hbm [thread:$0]  %s1513_s1, 64, %s2459_s7, [#allocation3]  }
 0x9c5   :  { %2040 = dma.done.wait [#allocation3], 64  }
 0x9c6   :  { %2041 = vsyncadd [#allocation3], 4294967232 }
 0x9c7   :  { %2042 = dma.done.wait [#allocation5], 128  }
 0x9c8   :  { %2043 = vsyncadd [#allocation5], 4294967168 }
 0x9c9   :  { %1553 = vsyncpa [#allocation3], 1 }
 0x9ca   :  { %1554 = vsyncpa [#allocation5], 1 }

</bundles_post_ra>
